<compile_context>
chip_gen: v7x
topology: tpu7x:2x2x1
jax: 0.10.0
libtpu: 0.0.40
codegen_flags: <defaults>
</compile_context>

<pallas_src>
import functools
import math

import jax
import jax.numpy as jnp
from jax import lax
from jax.experimental import pallas as pl
from jax.experimental.pallas import tpu as pltpu


def _pick_head_group(num_heads, head_dim):
    """Smallest head count per group whose concatenated width is lane-dense
    (multiple of 128) and divides num_heads. Heads in one group share a single
    wide output store and one loop iteration."""
    for g in range(1, num_heads + 1):
        if num_heads % g == 0 and (g * head_dim) % 128 == 0:
            return g
    # No lane-dense grouping possible: process everything in one group if the
    # merged width is small, otherwise fall back to per-head processing.
    return num_heads if num_heads * head_dim <= 512 else 1


def _attention_body(x_ref, ctx_ref, mask_ref,
                    wq_ref, bq_ref, wkv_ref, bkv_ref,
                    out_ref, score_ref,
                    q_scr, kv_scr, o_scr,
                    *, num_heads, head_dim, head_group, compute_dtype):
    group = head_group
    gw = group * head_dim
    n_groups = num_heads // group
    inv_sqrt = 1.0 / math.sqrt(head_dim)

    # --- K / V projection: depends only on the batch index, so do it once per
    # batch element (first query tile) with one fused (Hc, 2H) matmul and cache
    # the result in VMEM scratch (group-major layout: leading-axis indexing only).
    @pl.when(pl.program_id(1) == 0)
    def _():
        cc = ctx_ref[0].astype(compute_dtype)                         # (Sk, Hc)
        kv = jnp.dot(cc, wkv_ref[...], preferred_element_type=jnp.float32)
        kv = (kv + bkv_ref[...]).astype(compute_dtype)                # (Sk, 2H)
        for gi in range(n_groups):
            kv_scr[gi] = kv[:, gi * gw:(gi + 1) * gw]                             # K group gi
            kv_scr[n_groups + gi] = kv[:, n_groups * gw + gi * gw:
                                          n_groups * gw + (gi + 1) * gw]          # V group gi

    # --- Q projection for this query tile; fold 1/sqrt(dh) into Q once.
    xc = x_ref[0].astype(compute_dtype)                               # (tq, H)
    q = jnp.dot(xc, wq_ref[...], preferred_element_type=jnp.float32) + bq_ref[...]
    q = (q * inv_sqrt).astype(compute_dtype)
    for gi in range(n_groups):
        q_scr[gi] = q[:, gi * gw:(gi + 1) * gw]

    # Additive key mask kept as a single (1, Sk) row; the per-head add is a
    # free sublane broadcast (no (tq, Sk) materialization).
    mask_row = mask_ref[0, 0].astype(jnp.float32)

    nt_dims = (((1,), (1,)), ((), ()))        # Q @ K^T without transposing K

    def group_body(g, carry):
        q_g = q_scr[g]                        # (tq, gw)  bf16
        k_g = kv_scr[g]                       # (Sk, gw)  bf16
        v_g = kv_scr[n_groups + g]            # (Sk, gw)  bf16
        parts = []
        for j in range(group):                # tiny static loop within a lane-dense group
            lo = j * head_dim
            hi = lo + head_dim
            s_h = lax.dot_general(q_g[:, lo:hi], k_g[:, lo:hi], nt_dims,
                                  preferred_element_type=jnp.float32)   # (tq, Sk)
            s_h = s_h + mask_row
            if score_ref is not None:
                score_ref[0, g * group + j] = s_h.astype(score_ref.dtype)
            m = jnp.max(s_h, axis=-1, keepdims=True)
            p = jnp.exp(s_h - m)
            probs = p * pl.reciprocal(jnp.sum(p, axis=-1, keepdims=True), approx=True)
            parts.append(jnp.dot(probs.astype(compute_dtype), v_g[:, lo:hi],
                                 preferred_element_type=jnp.float32))   # (tq, dh)
        ctx_g = parts[0] if group == 1 else jnp.concatenate(parts, axis=-1)
        o_scr[g] = ctx_g.astype(o_scr.dtype)
        return carry

    if n_groups == 1:
        group_body(0, 0)
    else:
        # Real loop bounds live ranges for many heads; unrolled when very short.
        lax.fori_loop(0, n_groups, group_body, 0, unroll=(n_groups <= 4))

    # One pass of lane-dense (group-width) stores into the merged-head output tile.
    for gi in range(n_groups):
        out_ref[0, :, gi * gw:(gi + 1) * gw] = o_scr[gi].astype(out_ref.dtype)


def _kernel_with_scores(x_ref, ctx_ref, mask_ref, wq_ref, bq_ref, wkv_ref, bkv_ref,
                        out_ref, score_ref, q_scr, kv_scr, o_scr, **kw):
    _attention_body(x_ref, ctx_ref, mask_ref, wq_ref, bq_ref, wkv_ref, bkv_ref,
                    out_ref, score_ref, q_scr, kv_scr, o_scr, **kw)


def _kernel_no_scores(x_ref, ctx_ref, mask_ref, wq_ref, bq_ref, wkv_ref, bkv_ref,
                      out_ref, q_scr, kv_scr, o_scr, **kw):
    _attention_body(x_ref, ctx_ref, mask_ref, wq_ref, bq_ref, wkv_ref, bkv_ref,
                    out_ref, None, q_scr, kv_scr, o_scr, **kw)


def bert_attention(hidden_states, context, attention_mask=None, params=None, *,
                   num_heads, q_tile=512, compute_dtype=jnp.bfloat16,
                   scores_dtype=jnp.bfloat16, return_scores=True):
    """hidden_states: (B, Sq, H); context: (B, Sk, Hc);
    attention_mask: (B, 1, 1, Sk) additive, or None. Weights stored as [in, out].
    Returns (context_layer, attention_scores) like the PyTorch module
    (attention_scores is None when return_scores=False)."""
    B, Sq, H = hidden_states.shape
    Bc, Sk, Hc = context.shape
    assert B == Bc and H % num_heads == 0
    head_dim = H // num_heads

    if attention_mask is None:
        attention_mask = jnp.zeros((B, 1, 1, Sk), jnp.float32)

    head_group = _pick_head_group(num_heads, head_dim)
    n_groups = num_heads // head_group
    gw = head_group * head_dim

    # Fused K/V projection weights (one wide MXU matmul); weights in bf16
    # (MXU-native, halves weight DMA), biases stay f32 (added post-accumulation).
    wq = params["wq"].astype(compute_dtype)
    wkv = jnp.concatenate([params["wk"], params["wv"]], axis=1).astype(compute_dtype)
    bq = params["bq"].astype(jnp.float32).reshape(1, H)
    bkv = jnp.concatenate([params["bk"].astype(jnp.float32).reshape(1, H),
                           params["bv"].astype(jnp.float32).reshape(1, H)], axis=1)

    # Generation-aware VMEM budget (v5e/v6e: 128 MiB, v7x: 64 MiB).
    try:
        phys_vmem = pltpu.get_tpu_info().vmem_capacity_bytes
    except Exception:
        phys_vmem = 64 * 1024 * 1024          # conservative (v7x)
    vmem_limit = min(int(phys_vmem * 0.85), 100 * 1024 * 1024)

    in_sz = hidden_states.dtype.itemsize
    ctx_sz = context.dtype.itemsize
    out_sz = hidden_states.dtype.itemsize
    sc_sz = jnp.dtype(scores_dtype).itemsize if return_scores else 0
    cd_sz = jnp.dtype(compute_dtype).itemsize

    def est_vmem(tq):
        b = 0
        b += 2 * tq * H * in_sz                            # hidden tile (double-buffered)
        b += 2 * Sk * Hc * ctx_sz                          # context
        b += 2 * Sk * 4                                    # mask
        b += 2 * (H * H + Hc * 2 * H) * cd_sz              # weights
        b += 2 * 3 * H * 4                                 # biases
        b += 2 * tq * H * out_sz                           # output tile
        b += 2 * num_heads * tq * Sk * sc_sz               # scores tile
        b += (tq * H + 2 * Sk * H) * cd_sz + tq * H * out_sz   # Q/KV/out scratch
        b += 4 * tq * Sk * 4 + 2 * Sk * 2 * H * 4          # live f32 intermediates
        return b

    # Largest multiple-of-8 divisor of Sq that is <= q_tile and fits the budget.
    cands = [t for t in range(min(q_tile, Sq), 7, -1) if Sq % t == 0 and t % 8 == 0]
    if not cands:
        cands = [Sq]                                       # full-dim escape of (8,128) rule
    tq = cands[-1]
    for t in cands:
        if est_vmem(t) <= int(0.8 * vmem_limit):
            tq = t
            break
    n_q = Sq // tq

    kernel = functools.partial(
        _kernel_with_scores if return_scores else _kernel_no_scores,
        num_heads=num_heads, head_dim=head_dim, head_group=head_group,
        compute_dtype=compute_dtype)

    in_specs = [
        pl.BlockSpec((1, tq, H), lambda b, qi: (b, qi, 0)),        # query-row tile
        pl.BlockSpec((1, Sk, Hc), lambda b, qi: (b, 0, 0)),        # context (fetched once per b)
        pl.BlockSpec((1, 1, 1, Sk), lambda b, qi: (b, 0, 0, 0)),   # additive mask row
        pl.BlockSpec((H, H), lambda b, qi: (0, 0)),                # Wq
        pl.BlockSpec((1, H), lambda b, qi: (0, 0)),                # bq
        pl.BlockSpec((Hc, 2 * H), lambda b, qi: (0, 0)),           # W_kv (fused)
        pl.BlockSpec((1, 2 * H), lambda b, qi: (0, 0)),            # b_kv (fused)
    ]
    # TODO(synk): on v7x, single-buffering the constant-index weight blocks
    # (pipeline_mode=pl.Buffered(1)) would free ~their VMEM for larger tiles.

    out_ctx_spec = pl.BlockSpec((1, tq, H), lambda b, qi: (b, qi, 0))
    ctx_shape = jax.ShapeDtypeStruct((B, Sq, H), hidden_states.dtype)

    scratch_shapes = [
        pltpu.VMEM((n_groups, tq, gw), compute_dtype),        # per-group Q (pre-scaled)
        pltpu.VMEM((2 * n_groups, Sk, gw), compute_dtype),    # per-group K (0..ng-1) and V (ng..)
        pltpu.VMEM((n_groups, tq, gw), hidden_states.dtype),  # per-group context output
    ]

    if return_scores:
        out_shape = (ctx_shape,
                     jax.ShapeDtypeStruct((B, num_heads, Sq, Sk), scores_dtype))
        out_specs = [out_ctx_spec,
                     pl.BlockSpec((1, num_heads, tq, Sk), lambda b, qi: (b, 0, qi, 0))]
    else:
        out_shape = ctx_shape
        out_specs = out_ctx_spec

    grid_spec = pltpu.PrefetchScalarGridSpec(
        num_scalar_prefetch=0,
        grid=(B, n_q),
        in_specs=in_specs,
        out_specs=out_specs,
        scratch_shapes=scratch_shapes)

    fn = pl.pallas_call(
        kernel,
        out_shape=out_shape,
        grid_spec=grid_spec,
        compiler_params=pltpu.CompilerParams(
            # K/V cached in VMEM across query tiles => qi axis must run
            # sequentially ("arbitrary"); megacore parallelism over batch.
            dimension_semantics=("parallel", "arbitrary"),
            vmem_limit_bytes=vmem_limit))

    outs = fn(hidden_states, context, attention_mask, wq, bq, wkv, bkv)
    if return_scores:
        return outs[0], outs[1]
    return outs, None


def _reference(hidden, context, mask, params, num_heads):
    """Plain-JAX f32 reference mirroring the PyTorch forward (eval mode)."""
    B, Sq, H = hidden.shape
    Sk = context.shape[1]
    dh = H // num_heads

    def lin(t, w, b):
        return jnp.einsum('bsh,hk->bsk', t, w) + b.reshape(-1)

    q = lin(hidden, params["wq"], params["bq"]).reshape(B, Sq, num_heads, dh).transpose(0, 2, 1, 3)
    k = lin(context, params["wk"], params["bk"]).reshape(B, Sk, num_heads, dh).transpose(0, 2, 1, 3)
    v = lin(context, params["wv"], params["bv"]).reshape(B, Sk, num_heads, dh).transpose(0, 2, 1, 3)
    scores = jnp.einsum('bhqd,bhkd->bhqk', q, k) / math.sqrt(dh) + mask
    probs = jax.nn.softmax(scores, axis=-1)
    ctx = jnp.einsum('bhqk,bhkd->bhqd', probs, v).transpose(0, 2, 1, 3).reshape(B, Sq, H)
    return ctx, scores


def _check(name, got, want, atol=3e-2, rtol=3e-2):
    got = jnp.asarray(got, jnp.float32)
    want = jnp.asarray(want, jnp.float32)
    if not jnp.allclose(got, want, atol=atol, rtol=rtol):
        raise AssertionError(
            f"{name}: max abs err {float(jnp.max(jnp.abs(got - want)))}")


def _make_params(key, h_in, h_out):
    ks = jax.random.split(key, 6)
    return {
        "wq": jax.random.normal(ks[0], (h_out, h_out), jnp.float32) * 0.05,
        "bq": jax.random.normal(ks[1], (1, h_out), jnp.float32) * 0.02,
        "wk": jax.random.normal(ks[2], (h_in, h_out), jnp.float32) * 0.05,
        "bk": jax.random.normal(ks[3], (1, h_out), jnp.float32) * 0.02,
        "wv": jax.random.normal(ks[4], (h_in, h_out), jnp.float32) * 0.05,
        "bv": jax.random.normal(ks[5], (1, h_out), jnp.float32) * 0.02,
    }


if __name__ == "__main__":
    # ---- Config 1: small BERT-like cross-attention (hidden=32, heads=4,
    # query seq=8, key/value seq=16, batch=2). Single query tile, static path.
    B, SQ, SK, H, NH = 2, 8, 16, 32, 4
    key = jax.random.PRNGKey(0)
    kp, kh, kc = jax.random.split(key, 3)
    params = _make_params(kp, H, H)
    hidden = jax.random.normal(kh, (B, SQ, H), jnp.float32)
    context = jax.random.normal(kc, (B, SK, H), jnp.float32)
    mask = jnp.zeros((B, 1, 1, SK), jnp.float32).at[1, 0, 0, -3:].set(-10000.0)

    ctx_out, scores = bert_attention(hidden, context, mask, params, num_heads=NH)
    jax.block_until_ready(ctx_out)
    jax.block_until_ready(scores)
    ref_ctx, ref_scores = _reference(hidden, context, mask, params, NH)
    _check("ctx[cfg1]", ctx_out, ref_ctx)
    _check("scores[cfg1]", scores, ref_scores)

    ctx_only, _ = bert_attention(hidden, context, mask, params, num_heads=NH,
                                 return_scores=False)
    jax.block_until_ready(ctx_only)
    _check("ctx[cfg1,no-scores]", ctx_only, ref_ctx)

    # ---- Config 2: exercises the pipelined paths — multiple query tiles
    # (K/V cached across qi) and multiple head groups (fori_loop + dynamic
    # group indexing): batch=1, seq=16, hidden=256, heads=2, q_tile=8.
    B2, SQ2, SK2, H2, NH2 = 1, 16, 16, 256, 2
    key2 = jax.random.PRNGKey(1)
    kp2, kh2, kc2 = jax.random.split(key2, 3)
    params2 = _make_params(kp2, H2, H2)
    hidden2 = jax.random.normal(kh2, (B2, SQ2, H2), jnp.float32)
    context2 = jax.random.normal(kc2, (B2, SK2, H2), jnp.float32)
    mask2 = jnp.zeros((B2, 1, 1, SK2), jnp.float32).at[0, 0, 0, -5:].set(-10000.0)

    ctx2, scores2 = bert_attention(hidden2, context2, mask2, params2,
                                   num_heads=NH2, q_tile=8)
    jax.block_until_ready(ctx2)
    jax.block_until_ready(scores2)
    ref_ctx2, ref_scores2 = _reference(hidden2, context2, mask2, params2, NH2)
    _check("ctx[cfg2]", ctx2, ref_ctx2)
    _check("scores[cfg2]", scores2, ref_scores2)

    # TODO(synk): is_visual_att=True branch (data-dependent in-place positional
    # add + ad-hoc Python score-masking loops over prox_pos / feat_len) and
    # attention_gate scaling are not translated; dropout is identity (eval mode).
    print("KERNEL_OK")
</pallas_src>

<mosaic_0001>
module attributes {stable_mosaic.version = 11 : i64} {
  func.func @_kernel_with_scores(%arg0: i32, %arg1: i32, %arg2: memref<1x8x32xf32, #tpu.memory_space<vmem>>, %arg3: memref<1x16x32xf32, #tpu.memory_space<vmem>>, %arg4: memref<1x1x1x16xf32, #tpu.memory_space<vmem>>, %arg5: memref<32x32xbf16, #tpu.memory_space<vmem>>, %arg6: memref<1x32xf32, #tpu.memory_space<vmem>>, %arg7: memref<32x64xbf16, #tpu.memory_space<vmem>>, %arg8: memref<1x64xf32, #tpu.memory_space<vmem>>, %arg9: memref<1x8x32xf32, #tpu.memory_space<vmem>>, %arg10: memref<1x4x8x16xbf16, #tpu.memory_space<vmem>>, %arg11: memref<1x8x32xbf16, #tpu.memory_space<vmem>>, %arg12: memref<2x16x32xbf16, #tpu.memory_space<vmem>>, %arg13: memref<1x8x32xf32, #tpu.memory_space<vmem>>) attributes {dimension_semantics = [#tpu.dimension_semantics<parallel>, #tpu.dimension_semantics<arbitrary>], iteration_bounds = array<i64: 2, 1>, scalar_prefetch = 0 : i64, scratch_operands = 3 : i64, tpu.core_type = #tpu.core_type<tc>, window_params = [{transform_indices = @transform_0, window_bounds = array<i64: 1, 8, 32>}, {transform_indices = @transform_1, window_bounds = array<i64: 1, 16, 32>}, {transform_indices = @transform_2, window_bounds = array<i64: 1, 1, 1, 16>}, {pipeline_mode = #tpu.pipeline_mode<synchronous>, transform_indices = @transform_3, window_bounds = array<i64: 32, 32>}, {pipeline_mode = #tpu.pipeline_mode<synchronous>, transform_indices = @transform_4, window_bounds = array<i64: 1, 32>}, {pipeline_mode = #tpu.pipeline_mode<synchronous>, transform_indices = @transform_5, window_bounds = array<i64: 32, 64>}, {pipeline_mode = #tpu.pipeline_mode<synchronous>, transform_indices = @transform_6, window_bounds = array<i64: 1, 64>}, {transform_indices = @transform_7, window_bounds = array<i64: 1, 8, 32>}, {transform_indices = @transform_8, window_bounds = array<i64: 1, 4, 8, 16>}]} {
    %c0_i32 = arith.constant 0 : i32
    %0 = arith.cmpi eq, %arg1, %c0_i32 : i32
    %1 = arith.extui %0 : i1 to i32
    %c0_i32_0 = arith.constant 0 : i32
    %2 = arith.cmpi ne, %1, %c0_i32_0 : i32
    scf.if %2 {
      %c0_62 = arith.constant 0 : index
      %c0_63 = arith.constant 0 : index
      %c0_64 = arith.constant 0 : index
      %122 = vector.load %arg3[%c0_62, %c0_63, %c0_64] : memref<1x16x32xf32, #tpu.memory_space<vmem>>, vector<1x16x32xf32>
      %123 = vector.shape_cast %122 : vector<1x16x32xf32> to vector<16x32xf32>
      %124 = arith.truncf %123 : vector<16x32xf32> to vector<16x32xbf16>
      %c0_65 = arith.constant 0 : index
      %c0_66 = arith.constant 0 : index
      %125 = vector.load %arg7[%c0_65, %c0_66] : memref<32x64xbf16, #tpu.memory_space<vmem>>, vector<32x64xbf16>
      %cst_67 = arith.constant dense<0.000000e+00> : vector<16x64xf32>
      %126 = tpu.matmul %124, %125, %cst_67 {dimension_numbers = #tpu.dot_dimension_numbers<[1], [0], [0], [1], [0, 0, 1, 1], [], []>} : vector<16x32xbf16>, vector<32x64xbf16>, vector<16x64xf32> -> vector<16x64xf32>
      %c0_68 = arith.constant 0 : index
      %c0_69 = arith.constant 0 : index
      %127 = vector.load %arg8[%c0_68, %c0_69] : memref<1x64xf32, #tpu.memory_space<vmem>>, vector<1x64xf32>
      %128 = vector.broadcast %127 : vector<1x64xf32> to vector<16x64xf32>
      %129 = arith.addf %126, %128 : vector<16x64xf32>
      %130 = arith.truncf %129 : vector<16x64xf32> to vector<16x64xbf16>
      %131 = vector.extract_strided_slice %130 {offsets = [0, 0], sizes = [16, 32], strides = [1, 1]} : vector<16x64xbf16> to vector<16x32xbf16>
      %c0_70 = arith.constant 0 : index
      %c0_71 = arith.constant 0 : index
      %c0_72 = arith.constant 0 : index
      %132 = vector.load %arg12[%c0_70, %c0_71, %c0_72] : memref<2x16x32xbf16, #tpu.memory_space<vmem>>, vector<1x16x32xbf16>
      %133 = vector.shape_cast %132 : vector<1x16x32xbf16> to vector<16x32xbf16>
      %134 = vector.shape_cast %131 : vector<16x32xbf16> to vector<1x16x32xbf16>
      tpu.vector_store %arg12[%c0_70, %c0_71, %c0_72], %134 {strides = array<i32>} : memref<2x16x32xbf16, #tpu.memory_space<vmem>>, vector<1x16x32xbf16>,
      %135 = vector.extract_strided_slice %130 {offsets = [0, 32], sizes = [16, 32], strides = [1, 1]} : vector<16x64xbf16> to vector<16x32xbf16>
      %c1_73 = arith.constant 1 : index
      %c0_74 = arith.constant 0 : index
      %c0_75 = arith.constant 0 : index
      %136 = vector.load %arg12[%c1_73, %c0_74, %c0_75] : memref<2x16x32xbf16, #tpu.memory_space<vmem>>, vector<1x16x32xbf16>
      %137 = vector.shape_cast %136 : vector<1x16x32xbf16> to vector<16x32xbf16>
      %138 = vector.shape_cast %135 : vector<16x32xbf16> to vector<1x16x32xbf16>
      tpu.vector_store %arg12[%c1_73, %c0_74, %c0_75], %138 {strides = array<i32>} : memref<2x16x32xbf16, #tpu.memory_space<vmem>>, vector<1x16x32xbf16>,
    } else {
    }
    %c0 = arith.constant 0 : index
    %c0_1 = arith.constant 0 : index
    %c0_2 = arith.constant 0 : index
    %3 = vector.load %arg2[%c0, %c0_1, %c0_2] : memref<1x8x32xf32, #tpu.memory_space<vmem>>, vector<1x8x32xf32>
    %4 = vector.shape_cast %3 : vector<1x8x32xf32> to vector<8x32xf32>
    %5 = arith.truncf %4 : vector<8x32xf32> to vector<8x32xbf16>
    %c0_3 = arith.constant 0 : index
    %c0_4 = arith.constant 0 : index
    %6 = vector.load %arg5[%c0_3, %c0_4] : memref<32x32xbf16, #tpu.memory_space<vmem>>, vector<32x32xbf16>
    %cst = arith.constant dense<0.000000e+00> : vector<8x32xf32>
    %7 = tpu.matmul %5, %6, %cst {dimension_numbers = #tpu.dot_dimension_numbers<[1], [0], [0], [1], [0, 0, 1, 1], [], []>} : vector<8x32xbf16>, vector<32x32xbf16>, vector<8x32xf32> -> vector<8x32xf32>
    %c0_5 = arith.constant 0 : index
    %c0_6 = arith.constant 0 : index
    %8 = vector.load %arg6[%c0_5, %c0_6] : memref<1x32xf32, #tpu.memory_space<vmem>>, vector<1x32xf32>
    %9 = vector.broadcast %8 : vector<1x32xf32> to vector<8x32xf32>
    %10 = arith.addf %7, %9 : vector<8x32xf32>
    %cst_7 = arith.constant 0.353553385 : f32
    %11 = vector.broadcast %cst_7 : f32 to vector<8x32xf32>
    %12 = arith.mulf %10, %11 : vector<8x32xf32>
    %13 = arith.truncf %12 : vector<8x32xf32> to vector<8x32xbf16>
    %c0_8 = arith.constant 0 : index
    %c0_9 = arith.constant 0 : index
    %c0_10 = arith.constant 0 : index
    %14 = vector.load %arg11[%c0_8, %c0_9, %c0_10] : memref<1x8x32xbf16, #tpu.memory_space<vmem>>, vector<1x8x32xbf16>
    %15 = vector.shape_cast %14 : vector<1x8x32xbf16> to vector<8x32xbf16>
    %16 = vector.shape_cast %13 : vector<8x32xbf16> to vector<1x8x32xbf16>
    tpu.vector_store %arg11[%c0_8, %c0_9, %c0_10], %16 {strides = array<i32>} : memref<1x8x32xbf16, #tpu.memory_space<vmem>>, vector<1x8x32xbf16>,
    %c0_11 = arith.constant 0 : index
    %c0_12 = arith.constant 0 : index
    %c0_13 = arith.constant 0 : index
    %c0_14 = arith.constant 0 : index
    %17 = vector.load %arg4[%c0_11, %c0_12, %c0_13, %c0_14] : memref<1x1x1x16xf32, #tpu.memory_space<vmem>>, vector<1x1x1x16xf32>
    %18 = vector.shape_cast %17 : vector<1x1x1x16xf32> to vector<1x16xf32>
    %c0_15 = arith.constant 0 : index
    %c0_16 = arith.constant 0 : index
    %c0_17 = arith.constant 0 : index
    %19 = vector.load %arg11[%c0_15, %c0_16, %c0_17] : memref<1x8x32xbf16, #tpu.memory_space<vmem>>, vector<1x8x32xbf16>
    %20 = vector.shape_cast %19 : vector<1x8x32xbf16> to vector<8x32xbf16>
    %c0_18 = arith.constant 0 : index
    %c0_19 = arith.constant 0 : index
    %c0_20 = arith.constant 0 : index
    %21 = vector.load %arg12[%c0_18, %c0_19, %c0_20] : memref<2x16x32xbf16, #tpu.memory_space<vmem>>, vector<1x16x32xbf16>
    %22 = vector.shape_cast %21 : vector<1x16x32xbf16> to vector<16x32xbf16>
    %c1 = arith.constant 1 : index
    %c0_21 = arith.constant 0 : index
    %c0_22 = arith.constant 0 : index
    %23 = vector.load %arg12[%c1, %c0_21, %c0_22] : memref<2x16x32xbf16, #tpu.memory_space<vmem>>, vector<1x16x32xbf16>
    %24 = vector.shape_cast %23 : vector<1x16x32xbf16> to vector<16x32xbf16>
    %25 = vector.extract_strided_slice %20 {offsets = [0, 0], sizes = [8, 8], strides = [1, 1]} : vector<8x32xbf16> to vector<8x8xbf16>
    %26 = vector.extract_strided_slice %22 {offsets = [0, 0], sizes = [16, 8], strides = [1, 1]} : vector<16x32xbf16> to vector<16x8xbf16>
    %cst_23 = arith.constant dense<0.000000e+00> : vector<8x16xf32>
    %27 = tpu.matmul %25, %26, %cst_23 {dimension_numbers = #tpu.dot_dimension_numbers<[1], [1], [0], [0], [0, 0, 1, 0], [], []>} : vector<8x8xbf16>, vector<16x8xbf16>, vector<8x16xf32> -> vector<8x16xf32>
    %28 = vector.broadcast %18 : vector<1x16xf32> to vector<8x16xf32>
    %29 = arith.addf %27, %28 : vector<8x16xf32>
    %30 = arith.truncf %29 : vector<8x16xf32> to vector<8x16xbf16>
    %c0_24 = arith.constant 0 : index
    %c0_25 = arith.constant 0 : index
    %c0_26 = arith.constant 0 : index
    %c0_27 = arith.constant 0 : index
    %31 = vector.load %arg10[%c0_24, %c0_25, %c0_26, %c0_27] : memref<1x4x8x16xbf16, #tpu.memory_space<vmem>>, vector<1x1x8x16xbf16>
    %32 = vector.shape_cast %31 : vector<1x1x8x16xbf16> to vector<8x16xbf16>
    %33 = vector.shape_cast %30 : vector<8x16xbf16> to vector<1x1x8x16xbf16>
    tpu.vector_store %arg10[%c0_24, %c0_25, %c0_26, %c0_27], %33 {strides = array<i32>} : memref<1x4x8x16xbf16, #tpu.memory_space<vmem>>, vector<1x1x8x16xbf16>,
    %cst_28 = arith.constant dense<0xFF800000> : vector<8xf32>
    %34 = vector.multi_reduction <maximumf>, %29, %cst_28 [1] : vector<8x16xf32> to vector<8xf32>
    %35 = vector.shape_cast %34 : vector<8xf32> to vector<8x1xf32>
    %36 = vector.broadcast %35 : vector<8x1xf32> to vector<8x16xf32>
    %37 = arith.subf %29, %36 : vector<8x16xf32>
    %38 = math.exp %37 : vector<8x16xf32>
    %cst_29 = arith.constant dense<0.000000e+00> : vector<8xf32>
    %39 = vector.multi_reduction <add>, %38, %cst_29 [1] : vector<8x16xf32> to vector<8xf32>
    %40 = vector.shape_cast %39 : vector<8xf32> to vector<8x1xf32>
    %41 = tpu.reciprocal %40 {approx = true} : vector<8x1xf32> -> vector<8x1xf32>
    %42 = vector.broadcast %41 : vector<8x1xf32> to vector<8x16xf32>
    %43 = arith.mulf %38, %42 : vector<8x16xf32>
    %44 = arith.truncf %43 : vector<8x16xf32> to vector<8x16xbf16>
    %45 = vector.extract_strided_slice %24 {offsets = [0, 0], sizes = [16, 8], strides = [1, 1]} : vector<16x32xbf16> to vector<16x8xbf16>
    %cst_30 = arith.constant dense<0.000000e+00> : vector<8x8xf32>
    %46 = tpu.matmul %44, %45, %cst_30 {dimension_numbers = #tpu.dot_dimension_numbers<[1], [0], [0], [1], [0, 0, 1, 1], [], []>} : vector<8x16xbf16>, vector<16x8xbf16>, vector<8x8xf32> -> vector<8x8xf32>
    %47 = vector.extract_strided_slice %20 {offsets = [0, 8], sizes = [8, 8], strides = [1, 1]} : vector<8x32xbf16> to vector<8x8xbf16>
    %48 = vector.extract_strided_slice %22 {offsets = [0, 8], sizes = [16, 8], strides = [1, 1]} : vector<16x32xbf16> to vector<16x8xbf16>
    %cst_31 = arith.constant dense<0.000000e+00> : vector<8x16xf32>
    %49 = tpu.matmul %47, %48, %cst_31 {dimension_numbers = #tpu.dot_dimension_numbers<[1], [1], [0], [0], [0, 0, 1, 0], [], []>} : vector<8x8xbf16>, vector<16x8xbf16>, vector<8x16xf32> -> vector<8x16xf32>
    %50 = vector.broadcast %18 : vector<1x16xf32> to vector<8x16xf32>
    %51 = arith.addf %49, %50 : vector<8x16xf32>
    %52 = arith.truncf %51 : vector<8x16xf32> to vector<8x16xbf16>
    %c0_32 = arith.constant 0 : index
    %c1_33 = arith.constant 1 : index
    %c0_34 = arith.constant 0 : index
    %c0_35 = arith.constant 0 : index
    %53 = vector.load %arg10[%c0_32, %c1_33, %c0_34, %c0_35] : memref<1x4x8x16xbf16, #tpu.memory_space<vmem>>, vector<1x1x8x16xbf16>
    %54 = vector.shape_cast %53 : vector<1x1x8x16xbf16> to vector<8x16xbf16>
    %55 = vector.shape_cast %52 : vector<8x16xbf16> to vector<1x1x8x16xbf16>
    tpu.vector_store %arg10[%c0_32, %c1_33, %c0_34, %c0_35], %55 {strides = array<i32>} : memref<1x4x8x16xbf16, #tpu.memory_space<vmem>>, vector<1x1x8x16xbf16>,
    %cst_36 = arith.constant dense<0xFF800000> : vector<8xf32>
    %56 = vector.multi_reduction <maximumf>, %51, %cst_36 [1] : vector<8x16xf32> to vector<8xf32>
    %57 = vector.shape_cast %56 : vector<8xf32> to vector<8x1xf32>
    %58 = vector.broadcast %57 : vector<8x1xf32> to vector<8x16xf32>
    %59 = arith.subf %51, %58 : vector<8x16xf32>
    %60 = math.exp %59 : vector<8x16xf32>
    %cst_37 = arith.constant dense<0.000000e+00> : vector<8xf32>
    %61 = vector.multi_reduction <add>, %60, %cst_37 [1] : vector<8x16xf32> to vector<8xf32>
    %62 = vector.shape_cast %61 : vector<8xf32> to vector<8x1xf32>
    %63 = tpu.reciprocal %62 {approx = true} : vector<8x1xf32> -> vector<8x1xf32>
    %64 = vector.broadcast %63 : vector<8x1xf32> to vector<8x16xf32>
    %65 = arith.mulf %60, %64 : vector<8x16xf32>
    %66 = arith.truncf %65 : vector<8x16xf32> to vector<8x16xbf16>
    %67 = vector.extract_strided_slice %24 {offsets = [0, 8], sizes = [16, 8], strides = [1, 1]} : vector<16x32xbf16> to vector<16x8xbf16>
    %cst_38 = arith.constant dense<0.000000e+00> : vector<8x8xf32>
    %68 = tpu.matmul %66, %67, %cst_38 {dimension_numbers = #tpu.dot_dimension_numbers<[1], [0], [0], [1], [0, 0, 1, 1], [], []>} : vector<8x16xbf16>, vector<16x8xbf16>, vector<8x8xf32> -> vector<8x8xf32>
    %69 = vector.extract_strided_slice %20 {offsets = [0, 16], sizes = [8, 8], strides = [1, 1]} : vector<8x32xbf16> to vector<8x8xbf16>
    %70 = vector.extract_strided_slice %22 {offsets = [0, 16], sizes = [16, 8], strides = [1, 1]} : vector<16x32xbf16> to vector<16x8xbf16>
    %cst_39 = arith.constant dense<0.000000e+00> : vector<8x16xf32>
    %71 = tpu.matmul %69, %70, %cst_39 {dimension_numbers = #tpu.dot_dimension_numbers<[1], [1], [0], [0], [0, 0, 1, 0], [], []>} : vector<8x8xbf16>, vector<16x8xbf16>, vector<8x16xf32> -> vector<8x16xf32>
    %72 = vector.broadcast %18 : vector<1x16xf32> to vector<8x16xf32>
    %73 = arith.addf %71, %72 : vector<8x16xf32>
    %74 = arith.truncf %73 : vector<8x16xf32> to vector<8x16xbf16>
    %c0_40 = arith.constant 0 : index
    %c2 = arith.constant 2 : index
    %c0_41 = arith.constant 0 : index
    %c0_42 = arith.constant 0 : index
    %75 = vector.load %arg10[%c0_40, %c2, %c0_41, %c0_42] : memref<1x4x8x16xbf16, #tpu.memory_space<vmem>>, vector<1x1x8x16xbf16>
    %76 = vector.shape_cast %75 : vector<1x1x8x16xbf16> to vector<8x16xbf16>
    %77 = vector.shape_cast %74 : vector<8x16xbf16> to vector<1x1x8x16xbf16>
    tpu.vector_store %arg10[%c0_40, %c2, %c0_41, %c0_42], %77 {strides = array<i32>} : memref<1x4x8x16xbf16, #tpu.memory_space<vmem>>, vector<1x1x8x16xbf16>,
    %cst_43 = arith.constant dense<0xFF800000> : vector<8xf32>
    %78 = vector.multi_reduction <maximumf>, %73, %cst_43 [1] : vector<8x16xf32> to vector<8xf32>
    %79 = vector.shape_cast %78 : vector<8xf32> to vector<8x1xf32>
    %80 = vector.broadcast %79 : vector<8x1xf32> to vector<8x16xf32>
    %81 = arith.subf %73, %80 : vector<8x16xf32>
    %82 = math.exp %81 : vector<8x16xf32>
    %cst_44 = arith.constant dense<0.000000e+00> : vector<8xf32>
    %83 = vector.multi_reduction <add>, %82, %cst_44 [1] : vector<8x16xf32> to vector<8xf32>
    %84 = vector.shape_cast %83 : vector<8xf32> to vector<8x1xf32>
    %85 = tpu.reciprocal %84 {approx = true} : vector<8x1xf32> -> vector<8x1xf32>
    %86 = vector.broadcast %85 : vector<8x1xf32> to vector<8x16xf32>
    %87 = arith.mulf %82, %86 : vector<8x16xf32>
    %88 = arith.truncf %87 : vector<8x16xf32> to vector<8x16xbf16>
    %89 = vector.extract_strided_slice %24 {offsets = [0, 16], sizes = [16, 8], strides = [1, 1]} : vector<16x32xbf16> to vector<16x8xbf16>
    %cst_45 = arith.constant dense<0.000000e+00> : vector<8x8xf32>
    %90 = tpu.matmul %88, %89, %cst_45 {dimension_numbers = #tpu.dot_dimension_numbers<[1], [0], [0], [1], [0, 0, 1, 1], [], []>} : vector<8x16xbf16>, vector<16x8xbf16>, vector<8x8xf32> -> vector<8x8xf32>
    %91 = vector.extract_strided_slice %20 {offsets = [0, 24], sizes = [8, 8], strides = [1, 1]} : vector<8x32xbf16> to vector<8x8xbf16>
    %92 = vector.extract_strided_slice %22 {offsets = [0, 24], sizes = [16, 8], strides = [1, 1]} : vector<16x32xbf16> to vector<16x8xbf16>
    %cst_46 = arith.constant dense<0.000000e+00> : vector<8x16xf32>
    %93 = tpu.matmul %91, %92, %cst_46 {dimension_numbers = #tpu.dot_dimension_numbers<[1], [1], [0], [0], [0, 0, 1, 0], [], []>} : vector<8x8xbf16>, vector<16x8xbf16>, vector<8x16xf32> -> vector<8x16xf32>
    %94 = vector.broadcast %18 : vector<1x16xf32> to vector<8x16xf32>
    %95 = arith.addf %93, %94 : vector<8x16xf32>
    %96 = arith.truncf %95 : vector<8x16xf32> to vector<8x16xbf16>
    %c0_47 = arith.constant 0 : index
    %c3 = arith.constant 3 : index
    %c0_48 = arith.constant 0 : index
    %c0_49 = arith.constant 0 : index
    %97 = vector.load %arg10[%c0_47, %c3, %c0_48, %c0_49] : memref<1x4x8x16xbf16, #tpu.memory_space<vmem>>, vector<1x1x8x16xbf16>
    %98 = vector.shape_cast %97 : vector<1x1x8x16xbf16> to vector<8x16xbf16>
    %99 = vector.shape_cast %96 : vector<8x16xbf16> to vector<1x1x8x16xbf16>
    tpu.vector_store %arg10[%c0_47, %c3, %c0_48, %c0_49], %99 {strides = array<i32>} : memref<1x4x8x16xbf16, #tpu.memory_space<vmem>>, vector<1x1x8x16xbf16>,
    %cst_50 = arith.constant dense<0xFF800000> : vector<8xf32>
    %100 = vector.multi_reduction <maximumf>, %95, %cst_50 [1] : vector<8x16xf32> to vector<8xf32>
    %101 = vector.shape_cast %100 : vector<8xf32> to vector<8x1xf32>
    %102 = vector.broadcast %101 : vector<8x1xf32> to vector<8x16xf32>
    %103 = arith.subf %95, %102 : vector<8x16xf32>
    %104 = math.exp %103 : vector<8x16xf32>
    %cst_51 = arith.constant dense<0.000000e+00> : vector<8xf32>
    %105 = vector.multi_reduction <add>, %104, %cst_51 [1] : vector<8x16xf32> to vector<8xf32>
    %106 = vector.shape_cast %105 : vector<8xf32> to vector<8x1xf32>
    %107 = tpu.reciprocal %106 {approx = true} : vector<8x1xf32> -> vector<8x1xf32>
    %108 = vector.broadcast %107 : vector<8x1xf32> to vector<8x16xf32>
    %109 = arith.mulf %104, %108 : vector<8x16xf32>
    %110 = arith.truncf %109 : vector<8x16xf32> to vector<8x16xbf16>
    %111 = vector.extract_strided_slice %24 {offsets = [0, 24], sizes = [16, 8], strides = [1, 1]} : vector<16x32xbf16> to vector<16x8xbf16>
    %cst_52 = arith.constant dense<0.000000e+00> : vector<8x8xf32>
    %112 = tpu.matmul %110, %111, %cst_52 {dimension_numbers = #tpu.dot_dimension_numbers<[1], [0], [0], [1], [0, 0, 1, 1], [], []>} : vector<8x16xbf16>, vector<16x8xbf16>, vector<8x8xf32> -> vector<8x8xf32>
    %113 = tpu.concatenate %46, %68, %90, %112 in 1 : vector<8x8xf32>, vector<8x8xf32>, vector<8x8xf32>, vector<8x8xf32> -> vector<8x32xf32>
    %c0_53 = arith.constant 0 : index
    %c0_54 = arith.constant 0 : index
    %c0_55 = arith.constant 0 : index
    %114 = vector.load %arg13[%c0_53, %c0_54, %c0_55] : memref<1x8x32xf32, #tpu.memory_space<vmem>>, vector<1x8x32xf32>
    %115 = vector.shape_cast %114 : vector<1x8x32xf32> to vector<8x32xf32>
    %116 = vector.shape_cast %113 : vector<8x32xf32> to vector<1x8x32xf32>
    tpu.vector_store %arg13[%c0_53, %c0_54, %c0_55], %116 {strides = array<i32>} : memref<1x8x32xf32, #tpu.memory_space<vmem>>, vector<1x8x32xf32>,
    %c0_56 = arith.constant 0 : index
    %c0_57 = arith.constant 0 : index
    %c0_58 = arith.constant 0 : index
    %117 = vector.load %arg13[%c0_56, %c0_57, %c0_58] : memref<1x8x32xf32, #tpu.memory_space<vmem>>, vector<1x8x32xf32>
    %118 = vector.shape_cast %117 : vector<1x8x32xf32> to vector<8x32xf32>
    %c0_59 = arith.constant 0 : index
    %c0_60 = arith.constant 0 : index
    %c0_61 = arith.constant 0 : index
    %119 = vector.load %arg9[%c0_59, %c0_60, %c0_61] : memref<1x8x32xf32, #tpu.memory_space<vmem>>, vector<1x8x32xf32>
    %120 = vector.shape_cast %119 : vector<1x8x32xf32> to vector<8x32xf32>
    %121 = vector.shape_cast %118 : vector<8x32xf32> to vector<1x8x32xf32>
    tpu.vector_store %arg9[%c0_59, %c0_60, %c0_61], %121 {strides = array<i32>} : memref<1x8x32xf32, #tpu.memory_space<vmem>>, vector<1x8x32xf32>,
    return
  }
  func.func @transform_0(%arg0: i32, %arg1: i32) -> (i32, i32, i32) {
    %c0_i32 = arith.constant 0 : i32
    %c0_i32_0 = arith.constant 0 : i32
    return %arg0, %arg1, %c0_i32 : i32, i32, i32
  }
  func.func @transform_1(%arg0: i32, %arg1: i32) -> (i32, i32, i32) {
    %c0_i32 = arith.constant 0 : i32
    %c0_i32_0 = arith.constant 0 : i32
    %c0_i32_1 = arith.constant 0 : i32
    return %arg0, %c0_i32, %c0_i32_0 : i32, i32, i32
  }
  func.func @transform_2(%arg0: i32, %arg1: i32) -> (i32, i32, i32, i32) {
    %c0_i32 = arith.constant 0 : i32
    %c0_i32_0 = arith.constant 0 : i32
    %c0_i32_1 = arith.constant 0 : i32
    %c0_i32_2 = arith.constant 0 : i32
    return %arg0, %c0_i32, %c0_i32_0, %c0_i32_1 : i32, i32, i32, i32
  }
  func.func @transform_3(%arg0: i32, %arg1: i32) -> (i32, i32) {
    %c0_i32 = arith.constant 0 : i32
    %c0_i32_0 = arith.constant 0 : i32
    %c0_i32_1 = arith.constant 0 : i32
    return %c0_i32, %c0_i32_0 : i32, i32
  }
  func.func @transform_4(%arg0: i32, %arg1: i32) -> (i32, i32) {
    %c0_i32 = arith.constant 0 : i32
    %c0_i32_0 = arith.constant 0 : i32
    %c0_i32_1 = arith.constant 0 : i32
    return %c0_i32, %c0_i32_0 : i32, i32
  }
  func.func @transform_5(%arg0: i32, %arg1: i32) -> (i32, i32) {
    %c0_i32 = arith.constant 0 : i32
    %c0_i32_0 = arith.constant 0 : i32
    %c0_i32_1 = arith.constant 0 : i32
    return %c0_i32, %c0_i32_0 : i32, i32
  }
  func.func @transform_6(%arg0: i32, %arg1: i32) -> (i32, i32) {
    %c0_i32 = arith.constant 0 : i32
    %c0_i32_0 = arith.constant 0 : i32
    %c0_i32_1 = arith.constant 0 : i32
    return %c0_i32, %c0_i32_0 : i32, i32
  }
  func.func @transform_7(%arg0: i32, %arg1: i32) -> (i32, i32, i32) {
    %c0_i32 = arith.constant 0 : i32
    %c0_i32_0 = arith.constant 0 : i32
    return %arg0, %arg1, %c0_i32 : i32, i32, i32
  }
  func.func @transform_8(%arg0: i32, %arg1: i32) -> (i32, i32, i32, i32) {
    %c0_i32 = arith.constant 0 : i32
    %c0_i32_0 = arith.constant 0 : i32
    %c0_i32_1 = arith.constant 0 : i32
    return %arg0, %c0_i32, %arg1, %c0_i32_0 : i32, i32, i32, i32
  }
}

</mosaic_0001>

<bundles_post_ra>
// kernel: tpu_custom_call.1
= control target key start
LH: loop header
LB: loop body
LE: loop exit
PB: predicated region body
PF: predicated region fallthrough
CT: control target
= control target key end

     0   :  { %s2275_s0 = inlined_call_operand.hbm [shape: f32[2,8,32], index: 0, kind: input, shape index: {}]   ;;  %s2276_s1 = inlined_call_operand.hbm [shape: f32[2,16,32], index: 1, kind: input, shape index: {}]   ;;  %s2277_s2 = inlined_call_operand.vmem [shape: f32[2,1,1,16], index: 2, kind: input, shape index: {}]   ;;  %s2278_s3 = inlined_call_operand.hbm [shape: bf16[32,32], index: 3, kind: input, shape index: {}]   ;;  %s2279_s4 = inlined_call_operand.hbm [shape: f32[1,32], index: 4, kind: input, shape index: {}]   ;;  %s2280_s5 = inlined_call_operand.vmem [shape: bf16[32,64], index: 5, kind: input, shape index: {}]   ;;  %s2281_s6 = inlined_call_operand.vmem [shape: f32[1,64], index: 6, kind: input, shape index: {}]   ;;  %s2282_s7 = inlined_call_operand.hbm [shape: f32[2,8,32], index: 7, kind: output, shape index: {0}]   ;;  %s2283_s8 = inlined_call_operand.hbm [shape: bf16[2,4,8,16], index: 8, kind: output, shape index: {1}]  }
   0x1   :  { %2290 = sst [smem:[#allocation25_spill]] %s2275_s0 }
   0x2   :  { %2291 = sst [smem:[#allocation26_spill]] %s2278_s3 }
   0x3   :  { %2292 = sst [smem:[#allocation27_spill]] %s2279_s4 }
   0x4   :  { %14 = vsyncpa [#allocation6], 0 }
   0x5   :  { %16 = vsyncpa [#allocation6 + $0x1], 0 }
   0x6   :  { %17 = vsyncpa [#allocation9], 0 }
   0x7   :  { %19 = vsyncpa [#allocation9 + $0x1], 0 }
   0x8   :  { %20 = vsyncpa [#allocation12], 0 }
   0x9   :  { %21 = vsyncpa [#allocation7], 0 }
   0xa   :  { %23 = vsyncpa [#allocation7 + $0x1], 0 }
   0xb   :  { %24 = vsyncpa [#allocation15], 0 }
   0xc   :  { %26 = vsyncpa [#allocation15 + $0x1], 0  ;;  %s1838_s27 = smov 0   ;;  %s1840_s28 = smov 0  }
   0xd   :  { %s1842_s29 = smov 0   ;;  %s1844_s30 = smov 0  }
   0xe   :  { %s1846_s9 = smov 0   ;;  %s1848_s10 = smov 0  }
   0xf LB: > { %2293 = sst [smem:[#allocation22_spill]] %s1750_s27  ;;  %s1869_s11 = sadd.s32 4294967295, %s1770_s10   ;;  %s1770_s10 = sphi %s1848_s10, %s32_s10   ;;  %s1766_s9 = sphi %s1846_s9, %s2322_s9   ;;  %s1762_s30 = sphi %s1844_s30, %s2321_s30   ;;  %s1758_s29 = sphi %s1842_s29, %s2320_s29   ;;  %s1754_s28 = sphi %s1840_s28, %s2319_s28   ;;  %s1750_s27 = sphi %s1838_s27, %s2318_s27  }
  0x10   : > { %s1266_s12 = sadd.s32 4294967294, %s1770_s10   ;;  %p66_p0 = scmp.ne.s32.totalorder %s1754_s28, %s1750_s27 }
  0x11   : > { %p2284_p1 = scmp.eq.s32.totalorder %s1869_s11, 0  ;;  %p234_p3 = scmp.eq.s32.totalorder %s1266_s12, 1 }
  0x12   : > { %p1267_p5 = scmp.ge.s32.totalorder %s1770_s10, 1  ;;  %p269_p7 = scmp.lt.s32.totalorder %s1770_s10, 3 }
  0x13   : > { %p1878_p4 = por %p2284_p1, %p66_p0  ;;  %p1883_p6 = por %p234_p3, %p66_p0 }
  0x14   : > { %p1888_p8 = pnand %p1267_p5, %p269_p7  ;;  %s1772_s16 = smov [#allocation10]  }
  0x15   : > { %s2294_s13 = scalar_select %p1878_p4, 1, 0 }
  0x16   : > { %s2295_s14 = scalar_select %p1883_p6, 1, 0 }
  0x17   : > { %s281_s17 = sshll.u32 %s1772_s16, 4  ;;  %p1415_p9 = pneg %p1888_p8  ;;  %s1892_s17 = int_to_ptr.vmem [resolvable:$true] %s281_s17 }
  0x18   : > { %2296 = sst [smem:[#allocation23_spill]] %s2295_s14  ;;  %s1773_s19 = smov [#allocation11]  }
  0x19   : > { %p1899_p11 = pnand %p1415_p9, %p2284_p1  ;;  %s295_s20 = sshll.u32 %s1773_s19, 4  ;;  %s1903_s20 = int_to_ptr.vmem [resolvable:$true] %s295_s20 }
  0x1a   : > { %s2299_s3 = sld [smem:[#allocation26_spill]] }
  0x1b   : > { %p1530_p13 = pneg %p1899_p11 }
  0x20   : > { %s1528_s23 = scalar_lea.hbm %s2299_s3, 256 }
  0x21   : > { %p1529_p12 = scmp.ne.s32.totalorder %s2299_s3, %s1528_s23  ;;  %p1535_p5 = scmp.lt.u32.totalorder %s1528_s23, %s2299_s3 }
  0x23   : > { %p1531_p0 = pnand %p1530_p13, %p1529_p12 }
  0x25   : > { %p1532_p3 = pneg %p1531_p0 }
  0x27   : > { %p1537_p7 = pnand %p1535_p5, %p1532_p3 }
  0x29   : > { %1540 = shalt.err (!%p1537_p7)
}
  0x2a   : > { %s1541_s16 = scalar_lea.vmem %s1892_s17, 256  ;;  %p1549_p2 = scmp.lt.s32.totalorder %s1892_s17, %s1892_s17 }
  0x2b   : > { %p1542_p9 = scmp.ne.s32.totalorder %s1892_s17, %s1541_s16  ;;  %p1550_p12 = scmp.lt.s32.totalorder %s1541_s16, %s1541_s16 }
  0x2d   : > { %p1544_p10 = pnand %p1542_p9, %p1530_p13  ;;  %p1551_p0 = por %p1550_p12, %p1549_p2 }
  0x2f   : > { %p1545_p1 = pneg %p1544_p10 }
  0x31   : > { %p1552_p6 = pnand %p1551_p0, %p1545_p1 }
  0x33   : > { %1555 = shalt.err (!%p1552_p6)
}
  0x34   : > { %s1774_s19 = smov 64   ;;  %s1775_s21 = smov 4  }
  0x35   : > { %1418 = dma.hbm_to_vmem [thread:$0]  (!%p1899_p11), %s2299_s3, 256, %s1892_s17, [#allocation9], %s1774_s19, %s1774_s19, %s1775_s21  }
  0x36   : > { %s2300_s4 = sld [smem:[#allocation27_spill]] }
  0x3c   : > { %s1556_s26 = scalar_lea.hbm %s2300_s4, 16 }
  0x3d   : > { %p1557_p2 = scmp.ne.s32.totalorder %s2300_s4, %s1556_s26  ;;  %p1563_p10 = scmp.lt.u32.totalorder %s1556_s26, %s2300_s4 }
  0x3f   : > { %p1559_p1 = pnand %p1557_p2, %p1530_p13 }
  0x41   : > { %p1560_p6 = pneg %p1559_p1 }
  0x43   : > { %p1565_p3 = pnand %p1563_p10, %p1560_p6 }
  0x45   : > { %1568 = shalt.err (!%p1565_p3)
}
  0x46   : > { %s1569_s17 = scalar_lea.vmem %s1903_s20, 16  ;;  %s1576_s14 = scalar_lea.vmem %s1903_s20, 32 }
  0x47   : > { %p1570_p5 = scmp.ne.s32.totalorder %s1903_s20, %s1569_s17  ;;  %p1577_p12 = scmp.lt.s32.totalorder %s1903_s20, %s1903_s20 }
  0x48   : > { %p1578_p0 = scmp.lt.s32.totalorder %s1576_s14, %s1569_s17 }
  0x49   : > { %p1572_p7 = pnand %p1570_p5, %p1530_p13 }
  0x4a   : > { %p1579_p2 = por %p1578_p0, %p1577_p12 }
  0x4b   : > { %p1573_p9 = pneg %p1572_p7 }
  0x4d   : > { %p1580_p1 = pnand %p1579_p2, %p1573_p9 }
  0x4f   : > { %1583 = shalt.err (!%p1580_p1)
}
  0x50   : > { %1421 = dma.hbm_to_vmem [thread:$0]  (!%p1899_p11), %s2300_s4, 16, %s1903_s20, [#allocation12]  }
  0x51   : > { %s44_s21 = sadd.s32 1, %s1766_s9  ;;  %s53_s22 = sadd.s32 1, %s1758_s29 }
  0x52   : > { %p46_p13 = scmp.ge.s32.totalorder %s44_s21, 2  ;;  %p60_p6 = scmp.ne.s32.totalorder %s1758_s29, %s1754_s28 }
  0x53   : > { %p61_p10 = scmp.eq.s32.totalorder %s1770_s10, 0  ;;  %p1438_p3 = scmp.lt.s32.totalorder %s1770_s10, 2 }
  0x54   : > { %s2324_s21 = smov (%p46_p13, %s44_s21), 0  ;;  %p2302_p7 = scmp.eq.s32.totalorder %s1869_s11, 1 }
  0x55   : > { %2301 = sst [smem:[#allocation24_spill]] %s2324_s21  ;;  %p62_p5 = por %p61_p10, %p60_p6 }
  0x56   : > { %p1968_p9 = por %p2302_p7, %p60_p6  ;;  %s48_s23 = ssub.s32 %s1766_s9, %s2324_s21 }
  0x57   : > { %s1975_s24 = sand.u32 1, %s1758_s29   ;;  %p51_p11 = scmp.eq.s32.totalorder %s48_s23, 0 }
  0x58   : > { %s2303_s18 = scalar_select %p1968_p9, 1, 0 }
  0x59   : > { %s1271_s20 = sshll.u32 %s1975_s24, 3  ;;  %s1272_s25 = sshll.u32 %s1766_s9, 7 }
  0x5a   : > { %s1980_s26 = scalar_select %p51_p11, %s1758_s29, %s53_s22  }
  0x5b   : > { %s2304_s0 = sld [smem:[#allocation25_spill]]  ;;  %s316_s14 = scalar_lea.vmem [#allocation5], %s1271_s20 }
  0x5c   : > { %s324_s27 = sshll.u32 %s316_s14, 4  ;;  %p1989_p12 = pnand %p1438_p3, %p62_p5  ;;  %s1993_s27 = int_to_ptr.vmem [resolvable:$true] %s324_s27 }
  0x5d   : > { %s313_s23 = scalar_lea.sflag [#allocation6], %s1975_s24 }
  0x5e   : > { %p1586_p2 = pneg %p1989_p12 }
  0x61   : > { %s1985_s17 = scalar_lea.hbm %s2304_s0, %s1272_s25  ;;  %s1589_s16 = scalar_lea.hbm %s2304_s0, 256 }
  0x62   : > { %s1584_s12 = scalar_lea.hbm %s1985_s17, 128  ;;  %p1590_p6 = scmp.lt.u32.totalorder %s1985_s17, %s2304_s0 }
  0x63   : > { %p1585_p0 = scmp.ne.s32.totalorder %s1985_s17, %s1584_s12  ;;  %p1591_p10 = scmp.lt.u32.totalorder %s1589_s16, %s1584_s12 }
  0x64   : > { %p1593_p5 = scmp.lt.u32.totalorder %s1584_s12, %s1985_s17 }
  0x65   : > { %p1587_p1 = pnand %p1586_p2, %p1585_p0  ;;  %p1592_p3 = por %p1591_p10, %p1590_p6 }
  0x67   : > { %p1588_p13 = pneg %p1587_p1  ;;  %p1594_p7 = por %p1593_p5, %p1592_p3 }
  0x69   : > { %p1595_p11 = pnand %p1594_p7, %p1588_p13 }
  0x6b   : > { %1598 = shalt.err (!%p1595_p11)
}
  0x6c   : > { %s1599_s22 = scalar_lea.vmem %s1993_s27, 128  ;;  %s1776_s20 = smov [#allocation5]  }
  0x6d   : > { %p1600_p0 = scmp.ne.s32.totalorder %s1993_s27, %s1599_s22  ;;  %s1604_s25 = sshll.u32 %s1776_s20, 4  ;;  %s1605_s25 = int_to_ptr.vmem [resolvable:$false] %s1604_s25 }
  0x6e   : > { %s1606_s3 = scalar_lea.vmem %s1605_s25, 256  ;;  %p1607_p4 = scmp.lt.s32.totalorder %s1993_s27, %s1605_s25 }
  0x6f   : > { %p1602_p1 = pnand %p1600_p0, %p1586_p2  ;;  %p1608_p6 = scmp.lt.s32.totalorder %s1606_s3, %s1599_s22 }
  0x71   : > { %p1603_p9 = pneg %p1602_p1  ;;  %p1609_p10 = por %p1608_p6, %p1607_p4 }
  0x73   : > { %p1610_p3 = pnand %p1609_p10, %p1603_p9 }
  0x75   : > { %1613 = shalt.err (!%p1610_p3)
}
  0x76   : > { %1425 = dma.hbm_to_vmem [thread:$0]  (!%p1989_p12), %s1985_s17, 128, %s1993_s27, %s313_s23  }
  0x77   : > { %s1311_s12 = sshll.u32 %s1766_s9, 8  ;;  %s2306_s16 = sshll.u32 %s1975_s24, 4 }
  0x78   : > { %s335_s14 = scalar_lea.vmem [#allocation8], %s2306_s16  ;;  %s331_s25 = sand.u32 1, %s1770_s10  }
  0x79   : > { %s342_s20 = sshll.u32 %s335_s14, 4  ;;  %s2031_s0 = scalar_lea.hbm %s2276_s1, %s1311_s12  ;;  %s2025_s20 = int_to_ptr.vmem [resolvable:$true] %s342_s20 }
  0x7a   : > { %s2033_s4 = scalar_lea.sflag [#allocation9], %s331_s25  ;;  %s1614_s21 = scalar_lea.hbm %s2031_s0, 256 }
  0x7b   : > { %p1615_p4 = scmp.ne.s32.totalorder %s2031_s0, %s1614_s21  ;;  %s1619_s27 = scalar_lea.hbm %s2276_s1, 512 }
  0x7c   : > { %p1620_p5 = scmp.lt.u32.totalorder %s2031_s0, %s2276_s1  ;;  %p1621_p7 = scmp.lt.u32.totalorder %s1619_s27, %s1614_s21 }
  0x7d   : > { %p1617_p9 = pnand %p1615_p4, %p1586_p2  ;;  %p1623_p0 = scmp.lt.u32.totalorder %s1614_s21, %s2031_s0 }
  0x7e   : > { %p1622_p11 = por %p1621_p7, %p1620_p5 }
  0x7f   : > { %p1618_p13 = pneg %p1617_p9 }
  0x80   : > { %p1624_p1 = por %p1623_p0, %p1622_p11 }
  0x82   : > { %p1625_p6 = pnand %p1624_p1, %p1618_p13 }
  0x84   : > { %1628 = shalt.err (!%p1625_p6)
}
  0x85   : > { %s1629_s12 = scalar_lea.vmem %s2025_s20, 256  ;;  %s1777_s14 = smov [#allocation8]  }
  0x86   : > { %p1630_p10 = scmp.ne.s32.totalorder %s2025_s20, %s1629_s12  ;;  %s1634_s25 = sshll.u32 %s1777_s14, 4  ;;  %s1635_s25 = int_to_ptr.vmem [resolvable:$false] %s1634_s25 }
  0x87   : > { %s1636_s22 = scalar_lea.vmem %s1635_s25, 512  ;;  %p1637_p9 = scmp.lt.s32.totalorder %s2025_s20, %s1635_s25 }
  0x88   : > { %p1632_p3 = pnand %p1630_p10, %p1586_p2  ;;  %p1638_p5 = scmp.lt.s32.totalorder %s1636_s22, %s1629_s12 }
  0x8a   : > { %p1633_p4 = pneg %p1632_p3  ;;  %p1639_p7 = por %p1638_p5, %p1637_p9 }
  0x8c   : > { %p1640_p11 = pnand %p1639_p7, %p1633_p4 }
  0x8e   : > { %1643 = shalt.err (!%p1640_p11)
}
  0x8f   : > { %s1778_s21 = smov 128   ;;  %s1779_s3 = smov 8  }
  0x90   : > { %1428 = dma.hbm_to_vmem [thread:$0]  (!%p1989_p12), %s2031_s0, 256, %s2025_s20, %s2033_s4, %s1778_s21, %s1778_s21, %s1779_s3  }
  0x91   : > { %360 = sbr.rel (%p1888_p8) target bundleno = 1417 (0x589), region = 48  ;;  %s2062_s24 = sand.u32 (!%p1888_p8), 1, %s1754_s28  }
  0x92   : > { %s1277_s17 = sshll.u32 (!%p1888_p8), %s2062_s24, 3  ;;  %s363_s27 = scalar_lea.sflag (!%p1888_p8), [#allocation6], %s2062_s24 }
  0x93   : > { %s366_s23 = scalar_lea.vmem (!%p1888_p8), [#allocation5], %s1277_s17  ;;  %p2307_p2 = scmp.ne.s32.totalorder (!%p1888_p8), %s2294_s13, 0 }
  0x98   : > { %1725 = dma.done.wait (%p2307_p2), %s363_s27, 128  }
  0x99   : > { %1727 = vsyncadd (%p2307_p2), %s363_s27, 4294967168  ;;  %s371_s0 = sand.u32 1, %s1869_s11   ;;  %s1278_s4 = sshll.u32 %s2062_s24, 4 }
  0x9a   : > { %s372_s15 = scalar_lea.sflag [#allocation9], %s371_s0  ;;  %s375_s19 = scalar_lea.vmem [#allocation8], %s1278_s4 }
  0x9b   : > { %1729 = dma.done.wait (%p2307_p2), %s372_s15, 256  }
  0x9c   : > { %1731 = vsyncadd (%p2307_p2), %s372_s15, 4294967040  ;;  %p2308_p8 = scmp.eq.s32.totalorder %s1869_s11, 0 }
  0x9e   : > { %1733 = dma.done.wait (%p2308_p8), [#allocation9], 256   ;;  %p2309_p12 = pmov %p2308_p8 }
  0x9f   : > { %p2310_p13 = pmov %p2308_p8 }
  0xa0   : > { %1735 = vsyncadd (%p2309_p12), [#allocation9], 4294967040 }
  0xa1   : > { %1737 = dma.done.wait (%p2310_p13), [#allocation12], 16   ;;  %p2311_p0 = pmov %p2308_p8 }
  0xa2   : > { %v1780_v0 = vmov 0.0   ;;  %vm1781_vm0 = vmmov 0   ;;  %v1507_v1 = vld [vmem:[%s2280_s5] sm:$0xff]   ;;  %v1508_v2 = vld [vmem:[#allocation10] sm:$0xff]   ;;  %v1510_v4 = vld [vmem:[#allocation10 + $0x8] sm:$0xff]   ;;  %vm463_vm1 = vcmask 261120  }
  0xa3   : > { %1739 = vsyncadd (%p2311_p0), [#allocation12], 4294967280  ;;  %1335 = vmatprep.subr.bf16.mxu0 %v1780_v0  ;;  %1343 = vmatprep.subr.bf16.mxu1 %v1780_v0  ;;  %v1509_v3 = vld [vmem:[%s2280_s5 + $0x8] sm:$0xff]   ;;  %v1287_v10 = vld [vmem:[#allocation11] ss:$0 sm:$0xff]  ;;  %vm587_vm2 = vcmask 257024  }
  0xa4   : > { %1339 = vmatprep.mubr.msk.bf16.mxu0 %vm1781_vm0, %v1780_v0  ;;  %1347 = vmatprep.mubr.msk.bf16.mxu1 %vm1781_vm0, %v1780_v0  ;;  %v437_v5 = vld [vmem:[%s375_s19] sm:$0xff]  ;;  %v438_v6 = vld [vmem:[%s375_s19 + $0x8] sm:$0xff]  ;;  %vm600_vm3 = vcmask 64512   ;;  %s1782_s25 = smov 112   ;;  %s1783_s22 = smov 120   ;;  %vm650_vm4 = vcmask 130048  }
  0xa5   : > { %1336 = vmatpush3.bf16.msra.mxu0 %v1507_v1  ;;  %1344 = vmatpush3.bf16.msra.mxu1 %v1508_v2  ;;  %v516_v7 = vld [vmem:[%s366_s23] sm:$0xff]  ;;  %v439_v8 = vpack.c.bf16 %v438_v6, %v437_v5  ;;  %s1784_s21 = smov 104   ;;  %p429_p1 = scmp.lt.s32.totalorder %s1762_s30, 1  ;;  %vm648_vm5 = vcmask 125952  }
  0xa6   : > { %1337 = vmatprep.subr.bf16.mxu0 %v1780_v0  ;;  %1345 = vmatprep.subr.bf16.mxu1 %v1780_v0  ;;  %v517_v9 = vpack.c.bf16 %v516_v7, %v516_v7  ;;  %v1283_v11 = vld [vmem:[%s2281_s6] ss:$0 sm:$0xff]  ;;  %s2148_s15 = scalar_lea.vmem [#allocation14], %s1278_s4  ;;  %s1785_s4 = smov 96  }
  0xa7   : > { %s430_s3 = scalar_select %p429_p1, %s1762_s30, 1 }
  0xa8   : > { %s1786_s19 = smov 8   ;;  %s1787_s13 = smov 16  }
  0xa9   : > { %1338 = vmatpush3.bf16.msra.mxu0 %v1509_v3  ;;  %1346 = vmatpush3.bf16.msra.mxu1 %v1510_v4  ;;  %s431_s0 = scalar_lea.vmem %s2277_s2, %s430_s3  ;;  %s1312_s20 = sshll.u32 %s1762_s30, 8 }
  0xaa   : > { %1351 = vmatprep.subr.bf16.mxu0 %v1780_v0  ;;  %1357 = vmatprep.subr.bf16.mxu1 %v1780_v0  ;;  %v1291_v39 = vld [vmem:[%s431_s0] ss:$0 sm:$0xff]  ;;  %s1097_s11 = sshll.u32 %s2148_s15, 4  ;;  %s1788_s16 = smov 24   ;;  %s2190_s11 = int_to_ptr.vmem [resolvable:$true] %s1097_s11 }
  0xab   : > { %p2312_p10 = scmp.ne.s32.totalorder %s2303_s18, 0  ;;  %s1789_s3 = smov [#allocation14]  }
  0xac   : > { %1340 = vmatmul.mubr.msk.bf16.vlgmr.msra.gmra.mrb[0].mxu0 %vm463_vm1, %v439_v8  ;;  %1348 = vmatmul.mubr.msk.bf16.vlgmr.msra.gmra.mrb[0].mxu1 %vm463_vm1, %v517_v9  ;;  %s1648_s27 = sshll.u32 %s1789_s3, 4  ;;  %s1649_s27 = int_to_ptr.vmem [resolvable:$false] %s1648_s27 }
  0xad   : > { %1353 = vmatprep.mubr.msk.bf16.mxu0 %vm1781_vm0, %v1780_v0  ;;  %1359 = vmatprep.mubr.msk.bf16.mxu1 %vm1781_vm0, %v1780_v0  ;;  %s1650_s23 = scalar_lea.vmem %s1649_s27, 512  ;;  %p1651_p9 = scmp.lt.s32.totalorder %s2190_s11, %s1649_s27 }
 0x17f   : > { %v501_v12 = vpop.f32.mrb[0].mxu0  ;;  %v579_v14 = vpop.f32.mrb[0].mxu1 }
 0x180   : > { %v1341_v13 = vpop.f32.mrb[1].mxu0  ;;  %v580_v16 = vadd.f32 %v1287_v10, %v579_v14  ;;  %v1349_v17 = vpop.f32.mrb[1].mxu1  ;;  %v502_v18 = vadd.f32 %v1283_v11, %v501_v12 }
 0x181   : > { %v504_v15 = vpop.f32.mrb[2].mxu0  ;;  %v582_v21 = vpop.f32.mrb[2].mxu1 }
 0x182   : > { %v505_v19 = vadd.f32 %v1283_v11, %v504_v15  ;;  %v1342_v20 = vpop.f32.mrb[3].mxu0  ;;  %v585_v22 = vmul.f32 0.35355338, %v580_v16  ;;  %v1350_v23 = vpop.f32.mrb[3].mxu1 }
 0x184   : > { %v2113_v24 = vpack.c.bf16 %v505_v19, %v502_v18  ;;  %v586_v25 = vpack.c.bf16 %v585_v22, %v585_v22 }
 0x186   : > { %509 = vst.msk [vmem:[#allocation3] sm:$0xff] %vm463_vm1, %v2113_v24 }
 0x187   : > { %588 = vst.msk [vmem:[#allocation2] sm:$0xf] %vm587_vm2, %v586_v25 }
 0x18d   : > { %v591_v26 = vld [vmem:[#allocation3] sm:$0xff] }
 0x18e   : > { %824 = vrot.lane.b32.xlu1 %v591_v26, %s1782_s25  ;;  %712 = vrot.lane.b32.xlu0 %v591_v26, %s1783_s22  ;;  %v605_v27 = vsel %vm600_vm3, %v591_v26, 0  ;;  %v590_v28 = vld [vmem:[#allocation2] sm:$0xf] }
 0x18f   : > { %1352 = vmatpush3.bf16.xpose.msra.mxu0 %v605_v27  ;;  %v1294_v29 = vcombine.low %v590_v28, %v590_v28 }
 0x190   : > { %1363 = vmatprep.subr.bf16.mxu0 %v1780_v0 }
 0x192   : > { %822 = vrot.lane.b32.xlu1 %v1294_v29, %s1782_s25  ;;  %709 = vrot.lane.b32.xlu0 %v1294_v29, %s1783_s22 }
 0x196   : > { %933 = vrot.lane.b32.xlu1 %v1294_v29, %s1784_s21  ;;  %935 = vrot.lane.b32.xlu0 %v591_v26, %s1784_s21 }
 0x197   : > { %1354 = vmatmul.mubr.msk.bf16.vlgmr.msra.gmra.mrb[4].mxu0 %vm600_vm3, %v590_v28 }
 0x198   : > { %1365 = vmatprep.mubr.msk.bf16.mxu0 %vm1781_vm0, %v1780_v0 }
 0x200   : > { %v713_v30 = vpop.permute.xlu0 %712  ;;  %v825_v32 = vpop.permute.xlu1 %824 }
 0x201   : > { %v718_v31 = vsel %vm600_vm3, %v713_v30, 0  ;;  %v830_v34 = vsel %vm600_vm3, %v825_v32, 0 }
 0x202   : > { %1364 = vmatpush3.bf16.xpose.msra.mxu0 %v718_v31 }
 0x203   : > { %1375 = vmatprep.subr.bf16.mxu0 %v1780_v0 }
 0x204   : > { %v710_v33 = vpop.permute.xlu0 %709  ;;  %v823_v36 = vpop.permute.xlu1 %822 }
 0x208   : > { %v936_v35 = vpop.permute.xlu0 %935  ;;  %v934_v38 = vpop.permute.xlu1 %933 }
 0x209   : > { %1366 = vmatmul.mubr.msk.bf16.vlgmr.msra.gmra.mrb[8].mxu0 %vm600_vm3, %v710_v33  ;;  %v941_v37 = vsel %vm600_vm3, %v936_v35, 0 }
 0x20a   : > { %1376 = vmatpush3.bf16.xpose.msra.mxu0 %v830_v34  ;;  %1377 = vmatprep.mubr.msk.bf16.mxu0 %vm1781_vm0, %v1780_v0 }
 0x20b   : > { %1387 = vmatprep.subr.bf16.mxu0 %v1780_v0 }
 0x211   : > { %1378 = vmatmul.mubr.msk.bf16.vlgmr.msra.gmra.mrb[12].mxu0 %vm600_vm3, %v823_v36 }
 0x212   : > { %1388 = vmatpush3.bf16.xpose.msra.mxu0 %v941_v37  ;;  %1389 = vmatprep.mubr.msk.bf16.mxu0 %vm1781_vm0, %v1780_v0 }
 0x219   : > { %1390 = vmatmul.mubr.msk.bf16.vlgmr.msra.gmra.mrb[16].mxu0 %vm600_vm3, %v934_v38 }
 0x26a   : > { %v641_v40 = vpop.f32.mrb[4].mxu0 }
 0x26b   : > { %v642_v41 = vadd.f32 %v1291_v39, %v641_v40  ;;  %v1355_v42 = vpop.f32.mrb[5].mxu0 }
 0x26c   : > { %v644_v43 = vpop.f32.mrb[6].mxu0 }
 0x26d   : > { %v647_v44 = vpack.c.bf16 %v642_v41, %v642_v41  ;;  %v1356_v45 = vpop.f32.mrb[7].mxu0  ;;  %v651_v46 = vsel %vm650_vm4, %v642_v41, -inf }
 0x26e   : > { %652 = vmax.xlane.f32.xlu0 %v651_v46 }
 0x26f   : > { %649 = vst.msk [vmem:[%s2148_s15] sm:$0xf] %vm648_vm5, %v647_v44 }
 0x2dc   : > { %v754_v47 = vpop.f32.mrb[8].mxu0 }
 0x2dd   : > { %v755_v48 = vadd.f32 %v1291_v39, %v754_v47  ;;  %v1367_v49 = vpop.f32.mrb[9].mxu0 }
 0x2de   : > { %v757_v50 = vpop.f32.mrb[10].mxu0 }
 0x2df   : > { %v760_v51 = vpack.c.bf16 %v755_v48, %v755_v48  ;;  %v1368_v52 = vpop.f32.mrb[11].mxu0  ;;  %v763_v53 = vsel %vm650_vm4, %v755_v48, -inf }
 0x2e0   : > { %764 = vmax.xlane.f32.xlu1 %v763_v53 }
 0x2e1   : > { %1296 = vst.msk [vmem:[%s2148_s15 + $0x4] sm:$0xf] %vm648_vm5, %v760_v51 }
 0x2e4   : > { %v866_v54 = vpop.f32.mrb[12].mxu0 }
 0x2e5   : > { %v867_v55 = vadd.f32 %v1291_v39, %v866_v54  ;;  %v1379_v56 = vpop.f32.mrb[13].mxu0 }
 0x2e6   : > { %v869_v57 = vpop.f32.mrb[14].mxu0 }
 0x2e7   : > { %v872_v58 = vpack.c.bf16 %v867_v55, %v867_v55  ;;  %v1380_v59 = vpop.f32.mrb[15].mxu0  ;;  %v875_v60 = vsel %vm650_vm4, %v867_v55, -inf }
 0x2e8   : > { %876 = vmax.xlane.f32.xlu0 %v875_v60 }
 0x2e9   : > { %1299 = vst.msk [vmem:[%s2148_s15 + $0x8] sm:$0xf] %vm648_vm5, %v872_v58 }
 0x2ec   : > { %v977_v61 = vpop.f32.mrb[16].mxu0 }
 0x2ed   : > { %v978_v62 = vadd.f32 %v1291_v39, %v977_v61  ;;  %v1391_v63 = vpop.f32.mrb[17].mxu0 }
 0x2ee   : > { %v980_v1 = vpop.f32.mrb[18].mxu0 }
 0x2ef   : > { %v983_v2 = vpack.c.bf16 %v978_v62, %v978_v62  ;;  %v1392_v3 = vpop.f32.mrb[19].mxu0  ;;  %v986_v4 = vsel %vm650_vm4, %v978_v62, -inf }
 0x2f0   : > { %987 = vmax.xlane.f32.xlu0 %v986_v4 }
 0x2f1   : > { %1302 = vst.msk [vmem:[%s2148_s15 + $0xc] sm:$0xf] %vm648_vm5, %v983_v2  ;;  %511 = vrot.lane.b32.xlu1 %v2113_v24, %s1785_s4 }
 0x2fb   : > { %v653_v5 = vpop.xlane.xlu0 %652 }
 0x2fc   : > { %v654_v6 = vsub.f32 %v642_v41, %v653_v5 }
 0x2fe   : > { %v655_v7 = vmul.f32 1.442695, %v654_v6 }
 0x300   : > { %1512 = vpow2.f32 %v655_v7 }
 0x30a   : > { %v1513_v8 = vpop.eup %1512 }
 0x30b   : > { %v657_v9 = vsel %vm650_vm4, %v1513_v8, 0.0 }
 0x30c   : > { %658 = vadd.xlane.f32.xlu0 %v657_v9 }
 0x36d   : > { %v765_v10 = vpop.xlane.xlu1 %764 }
 0x36e   : > { %v766_v11 = vsub.f32 %v755_v48, %v765_v10 }
 0x370   : > { %v767_v12 = vmul.f32 1.442695, %v766_v11 }
 0x371   : > { %v512_v13 = vpop.permute.xlu1 %511 }
 0x372   : > { %1514 = vpow2.f32 %v767_v12  ;;  %515 = vst.msk [vmem:[#allocation3 + $0x8] sm:$0xff] %vm463_vm1, %v512_v13 }
 0x375   : > { %v877_v14 = vpop.xlane.xlu0 %876 }
 0x376   : > { %v878_v15 = vsub.f32 %v867_v55, %v877_v14 }
 0x378   : > { %v879_v16 = vmul.f32 1.442695, %v878_v15 }
 0x379   : > { %v593_v17 = vld [vmem:[#allocation3 + $0x8] sm:$0xff] }
 0x37a   : > { %1516 = vpow2.f32 %v879_v16  ;;  %776 = vrot.lane.b32.xlu1 %v593_v17, %s1783_s22  ;;  %1358 = vmatpush3.bf16.msra.mxu1 %v593_v17  ;;  %s1069_s22 = scalar_lea.sflag [#allocation15], %s2062_s24 }
 0x37b   : > { %1369 = vmatprep.subr.bf16.mxu1 %v1780_v0 }
 0x37c   : > { %v1515_v18 = vpop.eup %1514 }
 0x37d   : > { %v988_v19 = vpop.xlane.xlu0 %987  ;;  %v769_v20 = vsel %vm650_vm4, %v1515_v18, 0.0 }
 0x37e   : > { %v989_v21 = vsub.f32 %v978_v62, %v988_v19  ;;  %998 = vrot.lane.b32.xlu1 %v593_v17, %s1784_s21  ;;  %770 = vadd.xlane.f32.xlu0 %v769_v20  ;;  %s1644_s21 = scalar_lea.vmem %s2190_s11, 256 }
 0x37f   : > { %p1645_p6 = scmp.ne.s32.totalorder %s2190_s11, %s1644_s21  ;;  %p1652_p5 = scmp.lt.s32.totalorder %s1650_s23, %s1644_s21 }
 0x380   : > { %v990_v22 = vmul.f32 1.442695, %v989_v21 }
 0x381   : > { %p1646_p3 = pnand %p1645_p6, %p2312_p10  ;;  %p1653_p7 = por %p1652_p5, %p1651_p9 }
 0x382   : > { %1518 = vpow2.f32 %v990_v22 }
 0x383   : > { %p1647_p4 = pneg %p1646_p3 }
 0x384   : > { %v1517_v23 = vpop.eup %1516 }
 0x385   : > { %v881_v24 = vsel %vm650_vm4, %v1517_v23, 0.0  ;;  %p1654_p11 = pnand %p1653_p7, %p1647_p4 }
 0x386   : > { %882 = vadd.xlane.f32.xlu0 %v881_v24 }
 0x38c   : > { %v1519_v25 = vpop.eup %1518 }
 0x38d   : > { %v992_v26 = vsel %vm650_vm4, %v1519_v25, 0.0 }
 0x38e   : > { %993 = vadd.xlane.f32.xlu0 %v992_v26 }
 0x399   : > { %v659_v27 = vpop.xlane.xlu0 %658 }
 0x39a   : > { %1520 = vrcp.f32 %v659_v27 }
 0x3a4   : > { %v1521_v28 = vpop.eup %1520  ;;  %887 = vrot.lane.b32.xlu0 %v593_v17, %s1782_s25  ;;  %s2188_s25 = scalar_lea.hbm %s2283_s8, %s1312_s20 }
 0x3a5   : > { %v661_v29 = vmul.f32 %v1521_v28, %v1513_v8 }
 0x3a7   : > { %v662_v30 = vpack.c.bf16 %v661_v29, %v661_v29 }
 0x3a9   : > { %1360 = vmatmul.mubr.msk.bf16.vlgmr.msra.gmra.mrb[4].mxu1 %vm650_vm4, %v662_v30 }
 0x3aa   : > { %1371 = vmatprep.mubr.msk.bf16.mxu1 %vm1781_vm0, %v1780_v0 }
 0x3ec   : > { %v777_v31 = vpop.permute.xlu1 %776 }
 0x3ed   : > { %1370 = vmatpush3.bf16.msra.mxu1 %v777_v31 }
 0x3ee   : > { %1381 = vmatprep.subr.bf16.mxu1 %v1780_v0 }
 0x3f0   : > { %v999_v42 = vpop.permute.xlu1 %998 }
 0x40b   : > { %v771_v32 = vpop.xlane.xlu0 %770 }
 0x40c   : > { %1522 = vrcp.f32 %v771_v32 }
 0x413   : > { %v883_v33 = vpop.xlane.xlu0 %882 }
 0x414   : > { %1524 = vrcp.f32 %v883_v33 }
 0x416   : > { %v1523_v34 = vpop.eup %1522 }
 0x417   : > { %v773_v35 = vmul.f32 %v1523_v34, %v1515_v18 }
 0x419   : > { %v774_v36 = vpack.c.bf16 %v773_v35, %v773_v35 }
 0x41b   : > { %1372 = vmatmul.mubr.msk.bf16.vlgmr.msra.gmra.mrb[8].mxu1 %vm650_vm4, %v774_v36  ;;  %v994_v37 = vpop.xlane.xlu0 %993 }
 0x41c   : > { %1526 = vrcp.f32 %v994_v37  ;;  %1383 = vmatprep.mubr.msk.bf16.mxu1 %vm1781_vm0, %v1780_v0 }
 0x41e   : > { %v1525_v38 = vpop.eup %1524 }
 0x41f   : > { %v885_v39 = vmul.f32 %v1525_v38, %v1517_v23  ;;  %v888_v40 = vpop.permute.xlu0 %887 }
 0x420   : > { %1382 = vmatpush3.bf16.msra.mxu1 %v888_v40 }
 0x421   : > { %v886_v41 = vpack.c.bf16 %v885_v39, %v885_v39  ;;  %1393 = vmatprep.subr.bf16.mxu1 %v1780_v0 }
 0x423   : > { %1384 = vmatmul.mubr.msk.bf16.vlgmr.msra.gmra.mrb[12].mxu1 %vm650_vm4, %v886_v41 }
 0x424   : > { %1394 = vmatpush3.bf16.msra.mxu1 %v999_v42  ;;  %1395 = vmatprep.mubr.msk.bf16.mxu1 %vm1781_vm0, %v1780_v0 }
 0x426   : > { %v1527_v43 = vpop.eup %1526 }
 0x427   : > { %v996_v44 = vmul.f32 %v1527_v43, %v1519_v25 }
 0x429   : > { %v997_v45 = vpack.c.bf16 %v996_v44, %v996_v44 }
 0x42b   : > { %1396 = vmatmul.mubr.msk.bf16.vlgmr.msra.gmra.mrb[16].mxu1 %vm650_vm4, %v997_v45 }
 0x47c   : > { %v700_v46 = vpop.f32.mrb[4].mxu1 }
 0x47d   : > { %v1361_v47 = vpop.f32.mrb[5].mxu1 }
 0x47e   : > { %v703_v48 = vpop.f32.mrb[6].mxu1 }
 0x47f   : > { %v1362_v49 = vpop.f32.mrb[7].mxu1 }
 0x4ee   : > { %v816_v50 = vpop.f32.mrb[8].mxu1 }
 0x4ef   : > { %1045 = vrot.lane.b32.xlu1 %v816_v50, %s1786_s19  ;;  %v1373_v51 = vpop.f32.mrb[9].mxu1 }
 0x4f0   : > { %v819_v52 = vpop.f32.mrb[10].mxu1 }
 0x4f1   : > { %v1374_v53 = vpop.f32.mrb[11].mxu1 }
 0x4f6   : > { %v927_v54 = vpop.f32.mrb[12].mxu1 }
 0x4f7   : > { %1049 = vrot.lane.b32.xlu1 %v927_v54, %s1787_s13  ;;  %v1385_v0 = vpop.f32.mrb[13].mxu1 }
 0x4f8   : > { %v930_v55 = vpop.f32.mrb[14].mxu1 }
 0x4f9   : > { %v1386_v56 = vpop.f32.mrb[15].mxu1 }
 0x4fe   : > { %v1038_v57 = vpop.f32.mrb[16].mxu1 }
 0x4ff   : > { %1053 = vrot.lane.b32.xlu1 %v1038_v57, %s1788_s16  ;;  %v1397_v58 = vpop.f32.mrb[17].mxu1 }
 0x500   : > { %v1041_v59 = vpop.f32.mrb[18].mxu1 }
 0x501   : > { %v1398_v60 = vpop.f32.mrb[19].mxu1 }
 0x502   : > { %1657 = shalt.err (!%p1654_p11)
}
 0x503   : > { %s1658_s0 = scalar_lea.hbm %s2188_s25, 256  ;;  %s1662_s19 = scalar_lea.hbm %s2283_s8, 512 }
 0x504   : > { %p1659_p2 = scmp.ne.s32.totalorder %s2188_s25, %s1658_s0  ;;  %p1663_p13 = scmp.lt.u32.totalorder %s2188_s25, %s2283_s8 }
 0x505   : > { %p1664_p0 = scmp.lt.u32.totalorder %s1662_s19, %s1658_s0  ;;  %p1666_p6 = scmp.lt.u32.totalorder %s1658_s0, %s2188_s25 }
 0x506   : > { %p1660_p8 = pnand %p1659_p2, %p2312_p10 }
 0x507   : > { %p1665_p1 = por %p1664_p0, %p1663_p13 }
 0x508   : > { %p1661_p12 = pneg %p1660_p8 }
 0x509   : > { %p1667_p3 = por %p1666_p6, %p1665_p1 }
 0x50b   : > { %p1668_p4 = pnand %p1667_p3, %p1661_p12 }
 0x50d   : > { %1671 = shalt.err (!%p1668_p4)
}
 0x50e   : > { %s1790_s16 = smov 64   ;;  %s1791_s12 = smov 4   ;;  %vm1058_vm6 = vcmask 195584  }
 0x50f   : > { %1412 = dma.vmem_to_hbm [thread:$0]  (%p2312_p10), %s2190_s11, 256, %s2188_s25, %s1069_s22, %s1790_s16, %s1790_s16, %s1791_s12  }
 0x510   : > { %s1306_s14 = sshll.u32 %s1762_s30, 7  ;;  %s421_s21 = scalar_lea.vmem [#allocation13], %s1277_s17 }
 0x511   : > { %s1083_s3 = sshll.u32 %s421_s21, 4  ;;  %s2225_s11 = scalar_lea.hbm %s2282_s7, %s1306_s14  ;;  %s2227_s3 = int_to_ptr.vmem [resolvable:$true] %s1083_s3 }
 0x512   : > { %s1064_s25 = scalar_lea.sflag [#allocation7], %s2062_s24  ;;  %s1672_s22 = scalar_lea.vmem %s2227_s3, 128 }
 0x513   : > { %p1673_p9 = scmp.ne.s32.totalorder %s2227_s3, %s1672_s22  ;;  %s1792_s30 = smov [#allocation13]  }
 0x514   : > { %s1676_s17 = sshll.u32 %s1792_s30, 4  ;;  %s1677_s17 = int_to_ptr.vmem [resolvable:$false] %s1676_s17 }
 0x515   : > { %p1674_p5 = pnand %p1673_p9, %p2312_p10  ;;  %s1678_s0 = scalar_lea.vmem %s1677_s17, 256 }
 0x516   : > { %p1679_p11 = scmp.lt.s32.totalorder %s2227_s3, %s1677_s17  ;;  %p1680_p2 = scmp.lt.s32.totalorder %s1678_s0, %s1672_s22 }
 0x517   : > { %p1675_p7 = pneg %p1674_p5 }
 0x518   : > { %p1681_p8 = por %p1680_p2, %p1679_p11 }
 0x51a   : > { %p1682_p12 = pnand %p1681_p8, %p1675_p7 }
 0x561   : > { %v1046_v61 = vpop.permute.xlu1 %1045 }
 0x562   : > { %v1056_v63 = vsel %vm600_vm3, %v700_v46, %v1046_v61 }
 0x569   : > { %v1050_v62 = vpop.permute.xlu1 %1049 }
 0x56a   : > { %v1057_v1 = vsel %vm650_vm4, %v1056_v63, %v1050_v62 }
 0x571   : > { %v1054_v2 = vpop.permute.xlu1 %1053 }
 0x572   : > { %v1059_v3 = vsel %vm1058_vm6, %v1057_v1, %v1054_v2 }
 0x573   : > { %1060 = vst.msk [vmem:[#allocation4] sm:$0xff] %vm463_vm1, %v1059_v3 }
 0x57a   : > { %v1061_v4 = vld [vmem:[#allocation4] sm:$0xff] }
 0x57b   : > { %1062 = vst.msk [vmem:[%s421_s21] sm:$0xff] %vm463_vm1, %v1061_v4 }
 0x57c   : > { %1685 = shalt.err (!%p1682_p12)
}
 0x57d   : > { %s1686_s24 = scalar_lea.hbm %s2225_s11, 128  ;;  %s1690_s19 = scalar_lea.hbm %s2282_s7, 256 }
 0x57e   : > { %p1687_p13 = scmp.ne.s32.totalorder %s2225_s11, %s1686_s24  ;;  %p1691_p6 = scmp.lt.u32.totalorder %s2225_s11, %s2282_s7 }
 0x57f   : > { %p1692_p3 = scmp.lt.u32.totalorder %s1690_s19, %s1686_s24  ;;  %p1694_p9 = scmp.lt.u32.totalorder %s1686_s24, %s2225_s11 }
 0x580   : > { %p1688_p0 = pnand %p1687_p13, %p2312_p10 }
 0x581   : > { %p1693_p4 = por %p1692_p3, %p1691_p6 }
 0x582   : > { %p1689_p1 = pneg %p1688_p0 }
 0x583   : > { %p1695_p5 = por %p1694_p9, %p1693_p4 }
 0x585   : > { %p1696_p7 = pnand %p1695_p5, %p1689_p1 }
 0x587   : > { %1699 = shalt.err (!%p1696_p7)
}
 0x588   : > { %1411 = dma.vmem_to_hbm [thread:$0]  (%p2312_p10), %s2227_s3, 128, %s2225_s11, %s1064_s25  }
 0x589 PF: > { %s2313_s16 = sld [smem:[#allocation22_spill]]  ;;  %s2314_s12 = sld [smem:[#allocation23_spill]] }
 0x58a   : > { %p2316_p2 = scmp.ge.s32.totalorder %s1770_s10, 2 }
 0x58f   : > { %s1112_s14 = sand.u32 1, %s2313_s16   ;;  %p2315_p11 = scmp.ne.s32.totalorder %s2314_s12, 0 }
 0x590   : > { %s1113_s21 = scalar_lea.sflag [#allocation7], %s1112_s14 }
 0x591   : > { %p1430_p8 = pnand %p2316_p2, %p2315_p11 }
 0x593   : > { %1741 = dma.done.wait (!%p1430_p8), %s1113_s21, 128  }
 0x594   : > { %1743 = vsyncadd (!%p1430_p8), %s1113_s21, 4294967168  ;;  %s1122_s27 = scalar_lea.sflag [#allocation15], %s1112_s14 }
 0x595   : > { %1745 = dma.done.wait (!%p1430_p8), %s1122_s27, 256  }
 0x596   : > { %1747 = vsyncadd (!%p1430_p8), %s1122_s27, 4294967040  ;;  %s32_s10 = sadd.s32 1, %s1770_s10   ;;  %s2317_s18 = sld [smem:[#allocation24_spill]] }
 0x597   : > { %p29_p12 = scmp.ge.s32.totalorder %s32_s10, 4   ;;  %s2318_s27 = smov %s1754_s28 }
 0x598   : > { %s2319_s28 = smov %s1758_s29  ;;  %s2320_s29 = smov %s1980_s26 }
 0x599   : > { %s2321_s30 = smov %s1766_s9  ;;  %31 = sbr.rel (!%p29_p12) target bundleno = 15 (0xf), region = 143 }
 0x59c   : > { %s2322_s9 = smov %s2317_s18 }
 0x5a0   :  { %1127 = vsyncpa [#allocation6], 1 }
 0x5a1   :  { %1129 = vsyncpa [#allocation6 + $0x1], 1 }
 0x5a2   :  { %1130 = vsyncpa [#allocation9], 1 }
 0x5a3   :  { %1132 = vsyncpa [#allocation9 + $0x1], 1 }
 0x5a4   :  { %1133 = vsyncpa [#allocation12], 1 }
 0x5a5   :  { %1134 = vsyncpa [#allocation7], 1 }
 0x5a6   :  { %1136 = vsyncpa [#allocation7 + $0x1], 1 }
 0x5a7   :  { %1137 = vsyncpa [#allocation15], 1 }
 0x5a8   :  { %1139 = vsyncpa [#allocation15 + $0x1], 1 }

</bundles_post_ra>
